<compile_context>
chip_gen: v7x
topology: tpu7x:2x2x1
jax: 0.10.0
libtpu: 0.0.40
codegen_flags: <defaults>
</compile_context>

<pallas_src>
import jax
import jax.numpy as jnp
from jax.experimental import pallas as pl
from jax.experimental.pallas import tpu as pltpu


# IdentityMap.config equivalent (no parameters to initialize).
IDENTITY_MAP_CONFIG = {"mm_projector_type": "identity"}

# Per-tile byte budget. With input + output each double-buffered this is
# ~4x live in VMEM (~8 MiB) -> safe on v5e's 16 MiB default scoped limit.
_TARGET_TILE_BYTES = 2 * 1024 * 1024


def _identity_copy_kernel(x_ref, o_ref):
    # Pure passthrough of the current VMEM tile.
    o_ref[...] = x_ref[...]


def _round_up(v: int, m: int) -> int:
    return ((v + m - 1) // m) * m


def _pick_tile(extent: int, max_tile: int, quantum: int, search: int = 64) -> int:
    """Largest tile <= max_tile that is a multiple of `quantum` and, if one
    exists nearby, divides `extent` evenly (all blocks identical, unmasked
    stores). Otherwise returns the budget tile and relies on pl.cdiv + the
    masked tail block."""
    max_tile = max(quantum, (max_tile // quantum) * quantum)
    max_tile = min(max_tile, _round_up(extent, quantum))
    t = max_tile
    for _ in range(search):
        if t < quantum:
            break
        if extent % t == 0:
            return t
        t -= quantum
    return max_tile


def _identity_pallas(x: jax.Array, tile_bytes: int, donate: bool) -> jax.Array:
    """Explicit Pallas copy kernel implementing y = x (layout-preserving)."""
    orig_shape = x.shape

    # 0-D / 1-D inputs: prepend singleton dims (layout-preserving view, no
    # relayout copy) so we always have >= 2 dims for the (8,128) rules.
    xv = x
    while xv.ndim < 2:
        xv = xv[None]
    dims = xv.shape
    itemsize = jnp.dtype(xv.dtype).itemsize
    total_bytes = xv.size * itemsize

    d0 = dims[0]
    slab0_bytes = (xv.size // d0) * itemsize  # bytes per index of dim 0
    # Leading-dim tile quantum: for >=3-D arrays the trailing two dims stay
    # full, so any tile is legal; for 2-D arrays the sublane tile must be a
    # multiple of 8 (or span the whole dim).
    q0 = 1 if xv.ndim >= 3 else 8

    if slab0_bytes * q0 <= tile_bytes or d0 * slab0_bytes <= tile_bytes:
        # --- 1-D grid over the leading dim; all trailing dims full. ---
        t0_budget = max(1, tile_bytes // slab0_bytes)
        if total_bytes >= (1 << 20) and d0 >= 2 * q0:
            # Mid/large tensors: force >= 2 grid steps so v7x's two
            # TensorCores both participate on the "parallel" axis.
            t0_budget = min(t0_budget, _round_up(pl.cdiv(d0, 2), q0))
        if t0_budget >= d0:
            t0 = d0  # single full block (block == full dims is always legal)
        else:
            t0 = _pick_tile(d0, max(t0_budget, q0), q0)
        grid = (pl.cdiv(d0, t0),)
        block = (t0,) + dims[1:]
        index_map = lambda i: (i,) + (0,) * (len(dims) - 1)
        semantics = ("parallel",)
    elif xv.ndim >= 3:
        # --- One dim-0 slab is too big: 2-D grid over (dim0, dim1). ---
        # Trailing dims stay full, so any dim-1 tile is legal.
        d1 = dims[1]
        slab1_bytes = max(1, (xv.size // (d0 * d1)) * itemsize)
        t1 = max(1, min(d1, tile_bytes // slab1_bytes))
        t1 = d1 if t1 >= d1 else _pick_tile(d1, t1, 1)
        grid = (d0, pl.cdiv(d1, t1))
        block = (1, t1) + dims[2:]
        index_map = lambda i, j: (i, j) + (0,) * (len(dims) - 2)
        semantics = ("parallel", "parallel")
    else:
        # --- 2-D array whose rows exceed the budget: tile the lane axis. ---
        d1 = dims[1]
        t1 = max(128, ((tile_bytes // (8 * itemsize)) // 128) * 128)
        t1 = d1 if t1 >= d1 else _pick_tile(d1, t1, 128)
        t0 = min(d0, 8)
        grid = (pl.cdiv(d0, t0), pl.cdiv(d1, t1))
        block = (t0, t1)
        index_map = lambda i, j: (i, j)
        semantics = ("parallel", "parallel")

    out = pl.pallas_call(
        _identity_copy_kernel,
        out_shape=jax.ShapeDtypeStruct(dims, xv.dtype),
        grid_spec=pltpu.PrefetchScalarGridSpec(
            num_scalar_prefetch=0,
            grid=grid,
            in_specs=[pl.BlockSpec(block, index_map)],
            out_specs=pl.BlockSpec(block, index_map),
        ),
        # Opt-in: only alias when the caller actually donates the buffer;
        # unconditional aliasing makes XLA insert a defensive input copy.
        input_output_aliases={0: 0} if donate else {},
        # Advisory: pure memory copy (no flops), 1 read + 1 write of the array.
        cost_estimate=pl.CostEstimate(
            flops=0, transcendentals=0, bytes_accessed=2 * total_bytes),
        compiler_params=pltpu.CompilerParams(dimension_semantics=semantics),
    )(xv)

    return out.reshape(orig_shape)


def identity_map(x: jax.Array, *args,
                 force_kernel: bool = False,
                 donate: bool = False,
                 tile_bytes: int = _TARGET_TILE_BYTES,
                 **kwargs) -> jax.Array:
    """Pallas/JAX equivalent of IdentityMap.forward(x) == x.

    Default (fast path): returns ``x`` unchanged — zero HBM traffic and zero
    launch overhead, which is the optimal implementation of an identity
    projector.  Pass ``force_kernel=True`` to route through an explicit Pallas
    copy kernel (e.g. for benchmarking or to keep the op materialized).
    Extra ``*args``/``**kwargs`` are accepted and ignored, matching the
    PyTorch signature.
    """
    del args, kwargs
    if not force_kernel or x.size == 0:
        return x
    return _identity_pallas(x, tile_bytes=tile_bytes, donate=donate)


if __name__ == "__main__":
    key = jax.random.PRNGKey(0)

    # Projector-style (batch, seq, hidden) input.
    x = jax.random.normal(key, (2, 8, 32), dtype=jnp.float32)

    # Fast path: zero-cost identity.
    y_fast = identity_map(x)
    assert y_fast is x

    # Explicit Pallas kernel path (single full block, no reshape).
    y = jax.block_until_ready(identity_map(x, force_kernel=True))
    assert y.shape == x.shape and y.dtype == x.dtype
    assert bool(jnp.array_equal(y, x))

    # Odd shape + bf16: layout-preserving N-D path (no reshape, full block).
    x_odd = jax.random.normal(jax.random.PRNGKey(1), (3, 7, 33)).astype(jnp.bfloat16)
    y_odd = jax.block_until_ready(identity_map(x_odd, force_kernel=True))
    assert y_odd.shape == x_odd.shape and y_odd.dtype == x_odd.dtype
    assert bool(jnp.array_equal(y_odd, x_odd))

    # Force a multi-step grid with a partial (masked) tail block on a 2-D
    # array by shrinking the tile budget.
    x_big = jax.random.normal(jax.random.PRNGKey(2), (50, 128), dtype=jnp.float32)
    y_big = jax.block_until_ready(
        identity_map(x_big, force_kernel=True, tile_bytes=8 * 1024))
    assert y_big.shape == x_big.shape and y_big.dtype == x_big.dtype
    assert bool(jnp.array_equal(y_big, x_big))

    # 1-D input exercises the singleton-prepend path.
    x_vec = jax.random.normal(jax.random.PRNGKey(3), (40,), dtype=jnp.float32)
    y_vec = jax.block_until_ready(identity_map(x_vec, force_kernel=True))
    assert y_vec.shape == x_vec.shape and bool(jnp.array_equal(y_vec, x_vec))

    print("KERNEL_OK")
</pallas_src>

<mosaic_0001>
module attributes {stable_mosaic.version = 11 : i64} {
  func.func @_identity_copy_kernel(%arg0: i32, %arg1: memref<2x8x32xf32, #tpu.memory_space<vmem>>, %arg2: memref<2x8x32xf32, #tpu.memory_space<vmem>>) attributes {dimension_semantics = [#tpu.dimension_semantics<parallel>], iteration_bounds = array<i64: 1>, scalar_prefetch = 0 : i64, scratch_operands = 0 : i64, tpu.core_type = #tpu.core_type<tc>, window_params = [{transform_indices = @transform_0, window_bounds = array<i64: 2, 8, 32>}, {transform_indices = @transform_1, window_bounds = array<i64: 2, 8, 32>}]} {
    %c0 = arith.constant 0 : index
    %c0_0 = arith.constant 0 : index
    %c0_1 = arith.constant 0 : index
    %0 = vector.load %arg1[%c0, %c0_0, %c0_1] : memref<2x8x32xf32, #tpu.memory_space<vmem>>, vector<2x8x32xf32>
    %c0_2 = arith.constant 0 : index
    %c0_3 = arith.constant 0 : index
    %c0_4 = arith.constant 0 : index
    %1 = vector.load %arg2[%c0_2, %c0_3, %c0_4] : memref<2x8x32xf32, #tpu.memory_space<vmem>>, vector<2x8x32xf32>
    tpu.vector_store %arg2[%c0_2, %c0_3, %c0_4], %0 {strides = array<i32>} : memref<2x8x32xf32, #tpu.memory_space<vmem>>, vector<2x8x32xf32>,
    return
  }
  func.func @transform_0(%arg0: i32) -> (i32, i32, i32) {
    %c0_i32 = arith.constant 0 : i32
    %c0_i32_0 = arith.constant 0 : i32
    %c0_i32_1 = arith.constant 0 : i32
    return %arg0, %c0_i32, %c0_i32_0 : i32, i32, i32
  }
  func.func @transform_1(%arg0: i32) -> (i32, i32, i32) {
    %c0_i32 = arith.constant 0 : i32
    %c0_i32_0 = arith.constant 0 : i32
    %c0_i32_1 = arith.constant 0 : i32
    return %arg0, %c0_i32, %c0_i32_0 : i32, i32, i32
  }
}

</mosaic_0001>

<bundles_post_ra>
// kernel: tpu_custom_call.1
= control target key start
LH: loop header
LB: loop body
LE: loop exit
PB: predicated region body
PF: predicated region fallthrough
CT: control target
= control target key end

     0   :  { %6 = vsyncpa [#allocation3], 0  ;;  %s135_s0 = inlined_call_operand.hbm [shape: f32[2,8,32], index: 0, kind: input, shape index: {}]   ;;  %s136_s1 = inlined_call_operand.hbm [shape: f32[2,8,32], index: 1, kind: output, shape index: {}]  }
   0x1   :  { %7 = vsyncpa [#allocation4], 0  ;;  %s97_s6 = smov [#allocation2]   ;;  %s49_s10 = scalar_lea.hbm %s135_s0, 256 }
   0x2   :  { %s13_s7 = sshll.u32 %s97_s6, 4  ;;  %p50_p0 = scmp.ne.s32.totalorder %s135_s0, %s49_s10  ;;  %s14_s7 = int_to_ptr.vmem [resolvable:$true] %s13_s7 }
   0x3   :  { %p53_p1 = scmp.lt.u32.totalorder %s49_s10, %s135_s0 }
   0x5   :  { %p55_p2 = pnand %p53_p1, %p50_p0 }
   0x7   :  { %58 = shalt.err (!%p55_p2)
}
   0x8   :  { %s59_s15 = scalar_lea.vmem %s14_s7, 256  ;;  %p64_p4 = scmp.lt.s32.totalorder %s14_s7, %s14_s7 }
   0x9   :  { %p60_p3 = scmp.ne.s32.totalorder %s14_s7, %s59_s15  ;;  %p65_p5 = scmp.lt.s32.totalorder %s59_s15, %s59_s15 }
   0xb   :  { %p66_p6 = por %p65_p5, %p64_p4 }
   0xd   :  { %p67_p7 = pnand %p66_p6, %p60_p3 }
   0xf   :  { %70 = shalt.err (!%p67_p7)
}
  0x10   :  { %s98_s16 = smov 128   ;;  %s99_s17 = smov 8  }
  0x11   :  { %19 = dma.hbm_to_vmem [thread:$0]  %s135_s0, 256, %s14_s7, [#allocation3], %s98_s16, %s98_s16, %s99_s17  }
  0x12   :  { %93 = dma.done.wait [#allocation3], 256  }
  0x13   :  { %94 = vsyncadd [#allocation3], 4294967040  ;;  %s100_s20 = smov [#allocation5]   ;;  %vm25_vm0 = vcmask 261120   ;;  %v23_v0 = vld [vmem:[#allocation2] sm:$0xff]  ;;  %v24_v1 = vld [vmem:[#allocation2 + $0x8] sm:$0xff] }
  0x14   :  { %s33_s21 = sshll.u32 %s100_s20, 4  ;;  %26 = vst.msk [vmem:[#allocation5] sm:$0xff] %vm25_vm0, %v23_v0  ;;  %27 = vst.msk [vmem:[#allocation5 + $0x8] sm:$0xff] %vm25_vm0, %v24_v1  ;;  %s34_s21 = int_to_ptr.vmem [resolvable:$true] %s33_s21 }
  0x15   :  { %s71_s22 = scalar_lea.vmem %s34_s21, 256  ;;  %p76_p9 = scmp.lt.s32.totalorder %s34_s21, %s34_s21 }
  0x16   :  { %p72_p8 = scmp.ne.s32.totalorder %s34_s21, %s71_s22  ;;  %p77_p10 = scmp.lt.s32.totalorder %s71_s22, %s71_s22 }
  0x18   :  { %p78_p11 = por %p77_p10, %p76_p9 }
  0x1a   :  { %p79_p12 = pnand %p78_p11, %p72_p8 }
  0x1c   :  { %82 = shalt.err (!%p79_p12)
}
  0x1d   :  { %s83_s0 = scalar_lea.hbm %s136_s1, 256 }
  0x1e   :  { %p84_p13 = scmp.ne.s32.totalorder %s136_s1, %s83_s0  ;;  %p87_p0 = scmp.lt.u32.totalorder %s83_s0, %s136_s1 }
  0x20   :  { %p89_p1 = pnand %p87_p0, %p84_p13 }
  0x22   :  { %92 = shalt.err (!%p89_p1)
}
  0x23   :  { %39 = dma.vmem_to_hbm [thread:$0]  %s34_s21, 256, %s136_s1, [#allocation4], %s98_s16, %s98_s16, %s99_s17  }
  0x24   :  { %95 = dma.done.wait [#allocation4], 256  }
  0x25   :  { %96 = vsyncadd [#allocation4], 4294967040 }
  0x26   :  { %43 = vsyncpa [#allocation3], 1 }
  0x27   :  { %44 = vsyncpa [#allocation4], 1 }

</bundles_post_ra>
